<compile_context>
chip_gen: v7x
topology: tpu7x:2x2x1
jax: 0.10.0
libtpu: 0.0.40
codegen_flags: <defaults>
</compile_context>

<pallas_src>
import math

import jax
import jax.numpy as jnp
from jax.experimental import pallas as pl
from jax.experimental.pallas import tpu as pltpu


def _graph_conv_kernel(x_ref, m_ref, b_ref, o_ref):
    """One fused MXU matmul + lane-dense bias add for one (batch, time-tile) block.

    x_ref : (1, TILE_T, C_in*N)   bf16  time rows, (channel, vertex)-flattened minor
    m_ref : (C_in*N, N*C_out)     bf16  fused gso (x) W operand (grid-constant)
    b_ref : (1, N*C_out)          f32   bias pre-broadcast over vertices (grid-constant)
    o_ref : (1, TILE_T, N*C_out)        lane-dense output slab
    """
    acc = jnp.dot(x_ref[0], m_ref[...], preferred_element_type=jnp.float32)
    o_ref[0] = (acc + b_ref[...]).astype(o_ref.dtype)


def _pick_tile_t(t, k, f_out, out_itemsize):
    """Largest multiple-of-8 time tile whose double-buffered blocks fit VMEM."""
    try:
        vmem = pltpu.get_tpu_info().vmem_capacity_bytes  # 128 MiB v5e/v6e, 64 MiB v7x
    except Exception:
        vmem = 64 << 20                                  # conservative (v7x) fallback
    budget = vmem // 8               # headroom for resident M/bias + scoped default
    row_bytes = 2 * (k * 2 + f_out * out_itemsize)       # 2x-buffered bf16 x row + out row
    max_t = max(8, (budget // row_bytes) // 8 * 8)
    return t if t <= max_t else max_t


def graph_conv(x, gso, weight, bias=None, *, out_dtype=None):
    """GraphConv forward. x: (B, C_in, T, N) -> (B, T, N, C_out)."""
    B, C_in, T, N = x.shape
    C_out = weight.shape[1]
    out_dtype = x.dtype if out_dtype is None else out_dtype
    K = C_in * N
    F_out = N * C_out

    # Fused operand M[(c,i),(h,j)] = gso[h,i] * W[c,j]: graph shift + channel mix
    # become a single K = C_in*N contraction.  Built in f32, cast to bf16.
    # TODO(synk): fall back to a two-matmul kernel when C_in*N*N*C_out grows past a
    # few MiB (M is O(N^2 * C_in * C_out)); not needed at STGCN sizes.
    m = jnp.einsum('hi,cj->cihj', gso.astype(jnp.float32),
                   weight.astype(jnp.float32)).reshape(K, F_out)
    m = m.astype(jnp.bfloat16)

    if bias is None:
        b_row = jnp.zeros((1, F_out), jnp.float32)
    else:
        b_row = jnp.tile(bias.astype(jnp.float32).reshape(1, C_out),
                         (N, 1)).reshape(1, F_out)

    # x rows: (B, T, C_in*N) with row (b, t) flattened over (channel, vertex).
    # Tiny (~8 KB) XLA prep op; the kernel itself does no relayouts.  (Could be
    # fused into the input DMA via allow_input_fusion, or the caller could hand
    # over x already permuted.)
    x_rows = jnp.transpose(x, (0, 2, 1, 3)).reshape(B, T, K).astype(jnp.bfloat16)

    out_itemsize = jnp.dtype(out_dtype).itemsize
    tile_t = _pick_tile_t(T, K, F_out, out_itemsize)
    n_t = pl.cdiv(T, tile_t)
    T_pad = n_t * tile_t
    if T_pad != T:                       # ragged tail: zero-pad T, slice after the call
        x_rows = jnp.pad(x_rows, ((0, 0), (0, T_pad - T), (0, 0)))

    out = pl.pallas_call(
        _graph_conv_kernel,
        out_shape=jax.ShapeDtypeStruct((B, T_pad, F_out), out_dtype),
        grid=(B, n_t),
        in_specs=[
            pl.BlockSpec((1, tile_t, K), lambda b, t: (b, t, 0)),
            # Constant index maps: the pipeline keeps the same resident block, so
            # M and the bias row are only DMA'd once.
            pl.BlockSpec((K, F_out), lambda b, t: (0, 0)),
            pl.BlockSpec((1, F_out), lambda b, t: (0, 0)),
        ],
        out_specs=pl.BlockSpec((1, tile_t, F_out), lambda b, t: (b, t, 0)),
        compiler_params=pltpu.CompilerParams(
            dimension_semantics=("parallel", "parallel")),
    )(x_rows, m, b_row)

    if T_pad != T:
        out = out[:, :T]
    # Free, contiguous reshape back to the module's (B, T, N, C_out) layout.
    return out.reshape(B, T, N, C_out)


# ----------------------------------------------------------------------------
# Pure-JAX f32 reference (mirrors the PyTorch math) for a sanity check
# ----------------------------------------------------------------------------

def _ref_graph_conv(x, gso, weight, bias):
    hp = jax.lax.Precision.HIGHEST
    xp = jnp.transpose(x, (0, 2, 3, 1))
    first = jnp.einsum('hi,btij->bthj', gso, xp, precision=hp)
    second = jnp.einsum('bthi,ij->bthj', first, weight, precision=hp)
    return second + (0.0 if bias is None else bias)


# ----------------------------------------------------------------------------
# Main
# ----------------------------------------------------------------------------

if __name__ == "__main__":
    B, C_in, T, N, C_out = 2, 4, 16, 16, 32

    key = jax.random.PRNGKey(0)
    k1, k2, k3, k4 = jax.random.split(key, 4)

    x = jax.random.normal(k1, (B, C_in, T, N), jnp.float32)     # (B, C_in, T, N)
    A = jax.random.normal(k2, (N, N), jnp.float32)
    gso = 0.1 * (A + A.T) / math.sqrt(N)                        # symmetric GSO
    weight = 0.1 * jax.random.normal(k3, (C_in, C_out), jnp.float32)
    bias = 0.1 * jax.random.normal(k4, (C_out,), jnp.float32)

    fwd = jax.jit(graph_conv)
    out = jax.block_until_ready(fwd(x, gso, weight, bias))

    ref = _ref_graph_conv(x, gso, weight, bias)
    assert out.shape == (B, T, N, C_out), out.shape
    err = float(jnp.max(jnp.abs(out - ref)))
    assert err < 1e-2, f"max abs diff vs reference: {err}"

    print("KERNEL_OK")
</pallas_src>

<mosaic_0001>
module attributes {stable_mosaic.version = 11 : i64} {
  func.func @_graph_conv_kernel(%arg0: i32, %arg1: i32, %arg2: memref<1x16x64xbf16, #tpu.memory_space<vmem>>, %arg3: memref<64x512xbf16, #tpu.memory_space<vmem>>, %arg4: memref<1x512xf32, #tpu.memory_space<vmem>>, %arg5: memref<1x16x512xf32, #tpu.memory_space<vmem>>) attributes {dimension_semantics = [#tpu.dimension_semantics<parallel>, #tpu.dimension_semantics<parallel>], iteration_bounds = array<i64: 2, 1>, scalar_prefetch = 0 : i64, scratch_operands = 0 : i64, tpu.core_type = #tpu.core_type<tc>, window_params = [{transform_indices = @transform_0, window_bounds = array<i64: 1, 16, 64>}, {pipeline_mode = #tpu.pipeline_mode<synchronous>, transform_indices = @transform_1, window_bounds = array<i64: 64, 512>}, {pipeline_mode = #tpu.pipeline_mode<synchronous>, transform_indices = @transform_2, window_bounds = array<i64: 1, 512>}, {transform_indices = @transform_3, window_bounds = array<i64: 1, 16, 512>}]} {
    %c0 = arith.constant 0 : index
    %c0_0 = arith.constant 0 : index
    %c0_1 = arith.constant 0 : index
    %0 = vector.load %arg2[%c0, %c0_0, %c0_1] : memref<1x16x64xbf16, #tpu.memory_space<vmem>>, vector<1x16x64xbf16>
    %1 = vector.shape_cast %0 : vector<1x16x64xbf16> to vector<16x64xbf16>
    %c0_2 = arith.constant 0 : index
    %c0_3 = arith.constant 0 : index
    %2 = vector.load %arg3[%c0_2, %c0_3] : memref<64x512xbf16, #tpu.memory_space<vmem>>, vector<64x512xbf16>
    %cst = arith.constant dense<0.000000e+00> : vector<16x512xf32>
    %3 = tpu.matmul %1, %2, %cst {dimension_numbers = #tpu.dot_dimension_numbers<[1], [0], [0], [1], [0, 0, 1, 1], [], []>} : vector<16x64xbf16>, vector<64x512xbf16>, vector<16x512xf32> -> vector<16x512xf32>
    %c0_4 = arith.constant 0 : index
    %c0_5 = arith.constant 0 : index
    %4 = vector.load %arg4[%c0_4, %c0_5] : memref<1x512xf32, #tpu.memory_space<vmem>>, vector<1x512xf32>
    %5 = vector.broadcast %4 : vector<1x512xf32> to vector<16x512xf32>
    %6 = arith.addf %3, %5 : vector<16x512xf32>
    %c0_6 = arith.constant 0 : index
    %c0_7 = arith.constant 0 : index
    %c0_8 = arith.constant 0 : index
    %7 = vector.load %arg5[%c0_6, %c0_7, %c0_8] : memref<1x16x512xf32, #tpu.memory_space<vmem>>, vector<1x16x512xf32>
    %8 = vector.shape_cast %7 : vector<1x16x512xf32> to vector<16x512xf32>
    %9 = vector.shape_cast %6 : vector<16x512xf32> to vector<1x16x512xf32>
    tpu.vector_store %arg5[%c0_6, %c0_7, %c0_8], %9 {strides = array<i32>} : memref<1x16x512xf32, #tpu.memory_space<vmem>>, vector<1x16x512xf32>,
    return
  }
  func.func @transform_0(%arg0: i32, %arg1: i32) -> (i32, i32, i32) {
    %c0_i32 = arith.constant 0 : i32
    %c0_i32_0 = arith.constant 0 : i32
    return %arg0, %arg1, %c0_i32 : i32, i32, i32
  }
  func.func @transform_1(%arg0: i32, %arg1: i32) -> (i32, i32) {
    %c0_i32 = arith.constant 0 : i32
    %c0_i32_0 = arith.constant 0 : i32
    %c0_i32_1 = arith.constant 0 : i32
    return %c0_i32, %c0_i32_0 : i32, i32
  }
  func.func @transform_2(%arg0: i32, %arg1: i32) -> (i32, i32) {
    %c0_i32 = arith.constant 0 : i32
    %c0_i32_0 = arith.constant 0 : i32
    %c0_i32_1 = arith.constant 0 : i32
    return %c0_i32, %c0_i32_0 : i32, i32
  }
  func.func @transform_3(%arg0: i32, %arg1: i32) -> (i32, i32, i32) {
    %c0_i32 = arith.constant 0 : i32
    %c0_i32_0 = arith.constant 0 : i32
    return %arg0, %arg1, %c0_i32 : i32, i32, i32
  }
}

</mosaic_0001>

<bundles_post_ra>
// kernel: tile.6
= control target key start
LH: loop header
LB: loop body
LE: loop exit
PB: predicated region body
PF: predicated region fallthrough
CT: control target
= control target key end

     0   :  { %s28_s0 = inlined_call_operand.vmem [shape: f32[32], index: 0, kind: input, shape index: {}]   ;;  %s29_s1 = inlined_call_operand.vmem [shape: f32[16,1,1,32], index: 1, kind: output, shape index: {}]  }
   0x1   :  { %v4_v0 = vld [vmem:[%s28_s0] ss:$0 sm:$0xff] }
   0x2   :  { %5 = vst [vmem:[%s29_s1] sm:$0xff] %v4_v0  ;;  %8 = vst [vmem:[%s29_s1 + $0x8] sm:$0xff] %v4_v0 }

// kernel: tile.7
= control target key start
LH: loop header
LB: loop body
LE: loop exit
PB: predicated region body
PF: predicated region fallthrough
CT: control target
= control target key end

     0   :  { %s57_s8 = smov 96   ;;  %vm3_vm0 = vcmask 261120   ;;  %s59_s15 = smov 64   ;;  %vm9_vm1 = vcmask 1048320   ;;  %vm15_vm2 = vcmask 785920   ;;  %vm21_vm3 = vcmask 523520   ;;  %s94_s0 = inlined_call_operand.vmem [shape: f32[16,1,1,32], index: 0, kind: input, shape index: {}]   ;;  %s95_s1 = inlined_call_operand.vmem [shape: f32[1,512], index: 1, kind: output, shape index: {}]  }
   0x1   :  { %v48_v0 = vld [vmem:[%s94_s0 + $0x3] ss:$4 sm:$0xf]   ;;  %v49_v1 = vld [vmem:[%s94_s0 + $0x2] ss:$4 sm:$0xf]  }
   0x2   :  { %7 = vrot.lane.b32.xlu0 %v48_v0, %s57_s8  ;;  %v50_v2 = vld [vmem:[%s94_s0 + $0x1] ss:$4 sm:$0xf]   ;;  %v2_v3 = vld [vmem:[%s94_s0] ss:$4 sm:$0xf]  }
   0x3   :  { %s58_s0 = smov 32   ;;  %4 = vst.msk [vmem:[#allocation0] ss:$8 sm:$0xf] %vm3_vm0, %v2_v3  }
   0x4   :  { %19 = vrot.lane.b32.xlu1 %v50_v2, %s58_s0 }
   0x6   :  { %13 = vrot.lane.b32.xlu0 %v49_v1, %s59_s15 }
  0x74   :  { %v8_v4 = vpop.permute.xlu0 %7  }
  0x75   :  { %10 = vst.msk [vmem:[#allocation0] ss:$8 sm:$0xf] %vm9_vm1, %v8_v4  }
  0x76   :  { %v20_v5 = vpop.permute.xlu1 %19  }
  0x78   :  { %v14_v6 = vpop.permute.xlu0 %13  }
  0x79   :  { %16 = vst.msk [vmem:[#allocation0] ss:$8 sm:$0xf] %vm15_vm2, %v14_v6  }
  0x7a   :  { %22 = vst.msk [vmem:[#allocation0] ss:$8 sm:$0xf] %vm21_vm3, %v20_v5  }
  0x81   :  { %v26_v7 = vld [vmem:[#allocation0] sm:$0x1]  ;;  %v30_v8 = vld [vmem:[#allocation0 + $0x8] sm:$0x1]  ;;  %v35_v9 = vld [vmem:[#allocation0 + $0x10] sm:$0x1] }
  0x82   :  { %28 = vst [vmem:[%s95_s1] sm:$0x1] %v26_v7  ;;  %51 = vst [vmem:[%s95_s1 + $0x1] sm:$0x1] %v30_v8  ;;  %v41_v10 = vld [vmem:[#allocation0 + $0x18] sm:$0x1] }
  0x83   :  { %52 = vst [vmem:[%s95_s1 + $0x2] sm:$0x1] %v35_v9  ;;  %53 = vst [vmem:[%s95_s1 + $0x3] sm:$0x1] %v41_v10 }

// kernel: graph_conv.1
= control target key start
LH: loop header
LB: loop body
LE: loop exit
PB: predicated region body
PF: predicated region fallthrough
CT: control target
= control target key end

     0   :  { %s656_s12 = smov 0   ;;  %s658_s13 = smov 0   ;;  %s744_s0 = inlined_call_operand.vmem [shape: bf16[2,16,64], index: 0, kind: input, shape index: {}]   ;;  %s745_s1 = inlined_call_operand.vmem [shape: bf16[64,512], index: 1, kind: input, shape index: {}]   ;;  %s746_s2 = inlined_call_operand.vmem [shape: f32[1,512], index: 2, kind: input, shape index: {}]   ;;  %s747_s3 = inlined_call_operand.vmem [shape: f32[2,16,512], index: 3, kind: output, shape index: {}]  }
   0x1   :  { %s660_s14 = smov 0  }
   0x2 LB: > { %s25_s15 = sadd.s32 1, %s629_s13  ;;  %p533_p0 = scmp.ge.s32.totalorder %s633_s14, 1  ;;  %s633_s14 = sphi %s660_s14, %s13_s14   ;;  %s629_s13 = sphi %s658_s13, %s749_s13   ;;  %s625_s12 = sphi %s656_s12, %s748_s12  }
   0x3   : > { %p27_p1 = scmp.ge.s32.totalorder %s25_s15, 2  ;;  %p158_p2 = scmp.lt.s32.totalorder %s633_s14, 3 }
   0x5   : > { %s751_s15 = smov (%p27_p1, %s25_s15), 0  ;;  %p159_p3 = pnand %p533_p0, %p158_p2 }
   0x6   : > { %v586_v0 = vld [vmem:[%s745_s1 + $0x4] ss:$16 sps:$4 sm:$0xff] (!%p159_p3)   ;;  %p192_p4 = scmp.lt.s32.totalorder (!%p159_p3), %s625_s12, 1  ;;  %v588_v1 = vld [vmem:[%s745_s1 + $0xc] ss:$16 sps:$4 sm:$0xff] (!%p159_p3)   ;;  %v635_v2 = vmov (!%p159_p3), 0   ;;  %v233_v18 = vlaneseq (!%p159_p3) }
   0x7   : > { %162 = sbr.rel (%p159_p3) target bundleno = 242 (0xf2), region = 32  ;;  %374 = vmatprep.mubr.bf16.mxu0 (!%p159_p3), %v635_v2  ;;  %417 = vmatprep.mubr.bf16.mxu1 (!%p159_p3), %v635_v2  ;;  %v590_v3 = vld [vmem:[%s745_s1] ss:$16 sps:$4 sm:$0xff] (!%p159_p3)   ;;  %v591_v4 = vld [vmem:[%s745_s1 + $0x8] ss:$16 sps:$4 sm:$0xff] (!%p159_p3)   ;;  %vm338_vm0 = vcmask (!%p159_p3), 523264  }
   0x8   : > { %342 = vmatprep.subr.bf16.mxu0 (!%p159_p3), %v586_v0  ;;  %385 = vmatprep.subr.bf16.mxu1 (!%p159_p3), %v588_v1  ;;  %v592_v5 = vld [vmem:[%s745_s1 + $0x24] ss:$16 sps:$4 sm:$0xff] (!%p159_p3)   ;;  %v594_v6 = vld [vmem:[%s745_s1 + $0x2c] ss:$16 sps:$4 sm:$0xff] (!%p159_p3)   ;;  %v596_v7 = vld [vmem:[%s745_s1 + $0x20] ss:$16 sps:$4 sm:$0xff] (!%p159_p3)  }
   0x9   : > { %343 = vmatpush1.bf16.msra.mxu0 (!%p159_p3), %v590_v3  ;;  %386 = vmatpush1.bf16.msra.mxu1 (!%p159_p3), %v591_v4  ;;  %v597_v8 = vld [vmem:[%s745_s1 + $0x28] ss:$16 sps:$4 sm:$0xff] (!%p159_p3)   ;;  %v598_v9 = vld [vmem:[%s745_s1 + $0x44] ss:$16 sps:$4 sm:$0xff] (!%p159_p3)   ;;  %v600_v10 = vld [vmem:[%s745_s1 + $0x4c] ss:$16 sps:$4 sm:$0xff] (!%p159_p3)  }
   0xa   : > { %344 = vmatprep.subr.bf16.mxu0 (!%p159_p3), %v592_v5  ;;  %387 = vmatprep.subr.bf16.mxu1 (!%p159_p3), %v594_v6  ;;  %v602_v11 = vld [vmem:[%s745_s1 + $0x40] ss:$16 sps:$4 sm:$0xff] (!%p159_p3)   ;;  %v603_v12 = vld [vmem:[%s745_s1 + $0x48] ss:$16 sps:$4 sm:$0xff] (!%p159_p3)   ;;  %v604_v13 = vld [vmem:[%s745_s1 + $0x64] ss:$16 sps:$4 sm:$0xff] (!%p159_p3)  }
   0xb   : > { %v606_v14 = vld [vmem:[%s745_s1 + $0x6c] ss:$16 sps:$4 sm:$0xff] (!%p159_p3)   ;;  %v608_v15 = vld [vmem:[%s745_s1 + $0x60] ss:$16 sps:$4 sm:$0xff] (!%p159_p3)   ;;  %v609_v16 = vld [vmem:[%s745_s1 + $0x68] ss:$16 sps:$4 sm:$0xff] (!%p159_p3)  }
   0xc   : > { %v234_v19 = vshrl.u32 (!%p159_p3), %v233_v18, 7  ;;  %v231_v22 = vld [vmem:[%s746_s2] sm:$0xf] (!%p159_p3) }
   0xd   : > { %345 = vmatpush1.bf16.msra.mxu0 (!%p159_p3), %v596_v7  ;;  %388 = vmatpush1.bf16.msra.mxu1 (!%p159_p3), %v597_v8 }
   0xe   : > { %s753_s12 = smov (!%p192_p4, %s625_s12), 1  ;;  %346 = vmatprep.subr.bf16.mxu0 %v598_v9  ;;  %389 = vmatprep.subr.bf16.mxu1 %v600_v10  ;;  %v235_v20 = vsub.s32 0, %v234_v19  ;;  %v243_v21 = vsub.s32 2, %v234_v19  ;;  %v239_v23 = vsub.s32 1, %v234_v19  ;;  %v247_v24 = vsub.s32 3, %v234_v19 }
   0xf   : > { %s559_s7 = sshll.u32 %s753_s12, 3  ;;  %s560_s4 = sshll.u32 %s753_s12, 6 }
  0x10   : > { %s199_s24 = scalar_lea.vmem %s744_s0, %s559_s7  ;;  %v236_v25 = vrot.slane %v231_v22, %v235_v20  ;;  %v244_v26 = vrot.slane %v231_v22, %v243_v21  ;;  %v240_v27 = vrot.slane %v231_v22, %v239_v23  ;;  %v248_v28 = vrot.slane %v231_v22, %v247_v24  ;;  %s210_s7 = scalar_lea.vmem %s747_s3, %s560_s4 }
  0x11   : > { %347 = vmatpush1.bf16.msra.mxu0 %v602_v11  ;;  %390 = vmatpush1.bf16.msra.mxu1 %v603_v12  ;;  %v610_v17 = vld [vmem:[%s199_s24] sm:$0xff]  }
  0x12   : > { %348 = vmatprep.subr.bf16.mxu0 %v604_v13  ;;  %391 = vmatprep.subr.bf16.mxu1 %v606_v14 }
  0x15   : > { %349 = vmatpush1.bf16.msra.mxu0 %v608_v15  ;;  %392 = vmatpush1.bf16.msra.mxu1 %v609_v16 }
  0x18   : > { %555 = vmatmul.mubr.msk.bf16.vlgmr.msra.gmra.mrb[0].mxu0 %vm338_vm0, %v610_v17  ;;  %556 = vmatmul.mubr.msk.bf16.vlgmr.msra.gmra.mrb[0].mxu1 %vm338_vm0, %v610_v17 }
  0xeb   : > { %v376_v29 = vpop.f32.mrb[0].mxu0  ;;  %v419_v30 = vpop.f32.mrb[0].mxu1 }
  0xec   : > { %v377_v31 = vadd.f32 %v376_v29, %v236_v25  ;;  %v420_v32 = vadd.f32 %v419_v30, %v244_v26  ;;  %v378_v33 = vpop.f32.mrb[1].mxu0  ;;  %v421_v34 = vpop.f32.mrb[1].mxu1 }
  0xed   : > { %v379_v35 = vadd.f32 %v378_v33, %v240_v27  ;;  %v422_v36 = vadd.f32 %v421_v34, %v248_v28  ;;  %v380_v37 = vpop.f32.mrb[2].mxu0  ;;  %v423_v38 = vpop.f32.mrb[2].mxu1 }
  0xee   : > { %428 = vst [vmem:[%s210_s7] sm:$0xff] %v377_v31  ;;  %430 = vst [vmem:[%s210_s7 + $0x10] sm:$0xff] %v420_v32  ;;  %v381_v39 = vadd.f32 %v380_v37, %v236_v25  ;;  %v424_v40 = vadd.f32 %v423_v38, %v244_v26  ;;  %v382_v41 = vpop.f32.mrb[3].mxu0  ;;  %v425_v42 = vpop.f32.mrb[3].mxu1 }
  0xef   : > { %429 = vst [vmem:[%s210_s7 + $0x8] sm:$0xff] %v379_v35  ;;  %431 = vst [vmem:[%s210_s7 + $0x18] sm:$0xff] %v422_v36  ;;  %v383_v43 = vadd.f32 %v382_v41, %v240_v27  ;;  %v426_v44 = vadd.f32 %v425_v42, %v248_v28 }
  0xf0   : > { %432 = vst [vmem:[%s210_s7 + $0x20] sm:$0xff] %v381_v39  ;;  %434 = vst [vmem:[%s210_s7 + $0x30] sm:$0xff] %v424_v40 }
  0xf1   : > { %433 = vst [vmem:[%s210_s7 + $0x28] sm:$0xff] %v383_v43  ;;  %435 = vst [vmem:[%s210_s7 + $0x38] sm:$0xff] %v426_v44 }
  0xf2 PF: > { %s13_s14 = sadd.s32 1, %s633_s14   ;;  %s748_s12 = smov %s629_s13 }
  0xf3   : > { %p10_p5 = scmp.ge.s32.totalorder %s13_s14, 4   ;;  %s749_s13 = smov %s751_s15 }
  0xf5   :  { %12 = sbr.rel (!%p10_p5) target bundleno = 2 (0x2), region = 62 }

</bundles_post_ra>
